<compile_context>
chip_gen: v5e
topology: v5e:2x2
jax: 0.10.0
libtpu: 0.0.40
codegen_flags: <defaults>
</compile_context>

<pallas_src>
import functools

import jax
import jax.numpy as jnp
from jax import lax
from jax.experimental import pallas as pl
from jax.experimental.pallas import tpu as pltpu


def _round_up(x, m):
    return (x + m - 1) // m * m


def _reward_kernel(x_ref, act_ref, w1p_ref, w2_ref, tail_ref, out_ref, *,
                   num_actions, state_dim):
    # x_ref    [TB, S]      f32/bf16  state tile
    # act_ref  [TB, 2]      i32       (agent0, agent1) action indices
    # w1p_ref  [S + K1, H]  bf16      packed layer-1 weight:
    #                                   rows [0, S)        state columns of w1
    #                                   rows [S, S + 2*nA) per-action embed@w1
    #                                       (+ b1 folded into the agent-0 block)
    #                                   rows beyond        zero padding to K1
    # w2_ref   [H, H]       bf16
    # tail_ref [3, H]       f32       row0 = b2, row1 = w3 column, row2 = b3
    # out_ref  [1, TB]      f32       lane-dense output row
    x = x_ref[...].astype(jnp.bfloat16)        # no-op if producer handed bf16
    acts = act_ref[...]
    tb = x.shape[0]
    k1 = w1p_ref.shape[0] - state_dim

    # One-hot [TB, K1] selecting table row a0 (agent 0) and num_actions + a1
    # (agent 1). 0/1 is exact in bf16; padded table rows are never selected.
    iota = lax.broadcasted_iota(jnp.int32, (tb, k1), 1)
    onehot = ((iota == acts[:, 0:1]) |
              (iota == acts[:, 1:2] + num_actions)).astype(jnp.bfloat16)

    # Layer 1: a single bf16 MXU push with K = S + K1 (lane concat -> XLU slot),
    # f32 accumulation, f32 ReLU. b1 already folded into the table rows.
    xin = jnp.concatenate([x, onehot], axis=-1)                # [TB, S+K1] bf16
    h1 = jnp.dot(xin, w1p_ref[...], preferred_element_type=jnp.float32)
    h1 = jnp.maximum(h1, 0.0)                                  # f32 [TB, H]

    tail = tail_ref[...]                                       # f32 [3, H]

    # Layer 2: bf16 MXU, f32 bias/ReLU.
    h2 = jnp.dot(h1.astype(jnp.bfloat16), w2_ref[...],
                 preferred_element_type=jnp.float32)
    h2 = jnp.maximum(h2 + tail[0:1, :], 0.0)                   # f32 [TB, H]

    # Layer 3 (out_features = 1): VPU multiply + cross-lane reduce instead of a
    # 1-column MXU matmul; result laid out as a lane-dense [1, TB] row so the
    # store is an unmasked vst.
    out = jnp.sum(h2 * tail[1:2, :], axis=-1).reshape(1, tb)   # f32 [1, TB]
    out_ref[...] = (out + tail[2:3, 0:1]).astype(out_ref.dtype)


def reward_forward_pallas(state_vec, action_indices, w1p_bf16, w2_bf16, tail,
                          num_actions, state_dim, *, max_tile=2048):
    B, S = state_vec.shape
    H = w2_bf16.shape[0]
    K1 = w1p_bf16.shape[0] - S

    # Row tile: as large as possible (per-grid-step overhead ~0.35us dominates
    # the per-tile compute), multiple of 128 so the [1, TB] output row is
    # lane-dense, capped so large batches still get >= 4 grid steps for v7x
    # megacore sharding of the ("parallel",) axis. VMEM is never the limiter
    # here (TB=2048 working set << scoped VMEM on all generations).
    B_pad = _round_up(B, 128)
    TB = min(max_tile, max(128, _round_up(pl.cdiv(B_pad, 4), 128)))
    B_pad = _round_up(B_pad, TB)
    if B_pad != B:
        pad = B_pad - B
        state_vec = jnp.pad(state_vec, ((0, pad), (0, 0)))
        action_indices = jnp.pad(action_indices, ((0, pad), (0, 0)))
    num_tiles = B_pad // TB

    flops = 2 * B_pad * ((S + K1) * H + H * H + H)   # advisory (counts padding)
    bytes_accessed = (state_vec.size * state_vec.dtype.itemsize +
                      action_indices.size * 4 + w1p_bf16.size * 2 +
                      w2_bf16.size * 2 + tail.size * 4 + B_pad * 4)

    kernel = functools.partial(_reward_kernel, num_actions=num_actions,
                               state_dim=state_dim)

    out = pl.pallas_call(
        kernel,
        out_shape=jax.ShapeDtypeStruct((num_tiles, TB), jnp.float32),
        grid=(num_tiles,),
        in_specs=[
            pl.BlockSpec((TB, S), lambda i: (i, 0)),       # state tile
            pl.BlockSpec((TB, 2), lambda i: (i, 0)),       # action indices tile
            pl.BlockSpec((S + K1, H), lambda i: (0, 0)),   # packed w1: constant
            pl.BlockSpec((H, H), lambda i: (0, 0)),        #   index_maps ->
            pl.BlockSpec((3, H), lambda i: (0, 0)),        #   VMEM-resident
        ],
        out_specs=pl.BlockSpec((1, TB), lambda i: (i, 0)), # lane-dense rows
        compiler_params=pltpu.CompilerParams(
            dimension_semantics=("parallel",)),
        cost_estimate=pl.CostEstimate(flops=flops, transcendentals=0,
                                      bytes_accessed=bytes_accessed),
    )(state_vec, action_indices, w1p_bf16, w2_bf16, tail)

    return out.reshape(-1)[:B].reshape(B, 1)


class VectorRewardPredictorPallas:
    """JAX/Pallas port of the PyTorch VectorRewardPredictor forward pass."""

    def __init__(self, state_dim, action_embed_dim=4, num_actions=6,
                 hidden_dim=64, key=jax.random.PRNGKey(42)):
        self.state_dim = state_dim
        self.action_embed_dim = action_embed_dim
        self.num_actions = num_actions
        self.hidden_dim = hidden_dim
        total_input_dim = state_dim + 2 * action_embed_dim

        ks = jax.random.split(key, 7)
        init = lambda k, shape, scale: (scale * jax.random.normal(k, shape)
                                        ).astype(jnp.float32)
        # Master f32 parameters (weights stored [in, out] = PyTorch weight.T).
        self.embed_table = init(ks[0], (num_actions, action_embed_dim), 0.1)
        self.w1 = init(ks[1], (total_input_dim, hidden_dim), 0.05)
        self.b1 = init(ks[2], (1, hidden_dim), 0.05)
        self.w2 = init(ks[3], (hidden_dim, hidden_dim), 0.05)
        self.b2 = init(ks[4], (1, hidden_dim), 0.05)
        self.w3 = init(ks[5], (hidden_dim, 1), 0.05)
        self.b3 = init(ks[6], (1, 1), 0.05)

        # --- Kernel-side packed parameters (computed once at init) ---
        S, A, H = state_dim, action_embed_dim, hidden_dim
        # Fold the embedding lookup through layer 1 into per-action rows:
        #   T0[a] = embed[a] @ w1[S:S+A] + b1   (b1 folded exactly once here)
        #   T1[a] = embed[a] @ w1[S+A:S+2A]
        t0 = self.embed_table @ self.w1[S:S + A] + self.b1          # [nA, H]
        t1 = self.embed_table @ self.w1[S + A:S + 2 * A]            # [nA, H]
        k1 = _round_up(2 * num_actions, 8)                          # pad K to 8
        tbl = jnp.concatenate(
            [t0, t1, jnp.zeros((k1 - 2 * num_actions, H), jnp.float32)], axis=0)
        # Single packed bf16 layer-1 weight: [w1_state ; table] -> [S+K1, H].
        self.w1p_bf16 = jnp.concatenate([self.w1[:S], tbl],
                                        axis=0).astype(jnp.bfloat16)
        self.w2_bf16 = self.w2.astype(jnp.bfloat16)
        # tail stays f32: row0 = b2, row1 = w3 as a row, row2 = b3 broadcast.
        self.tail = jnp.concatenate(
            [self.b2, self.w3.T,
             jnp.full((1, H), self.b3[0, 0], jnp.float32)], axis=0)

    def __call__(self, state_vec, action_indices, return_embedding=False):
        if return_embedding:
            # Matches the PyTorch module exactly: returns state_vec unchanged.
            return state_vec
        state_vec = jnp.asarray(state_vec)
        if state_vec.dtype not in (jnp.float32, jnp.bfloat16):
            # Accept f32 or bf16 as-is (bf16 halves the state DMA); never add a
            # wrapper-side down-cast (that would be an extra HBM pass).
            state_vec = state_vec.astype(jnp.float32)
        return reward_forward_pallas(
            state_vec, jnp.asarray(action_indices).astype(jnp.int32),
            self.w1p_bf16, self.w2_bf16, self.tail,
            self.num_actions, self.state_dim)


def _reference_forward(model, state_vec, action_indices):
    # Pure-JAX f32 reference of the original module's math.
    e0 = jnp.take(model.embed_table, action_indices[:, 0], axis=0)
    e1 = jnp.take(model.embed_table, action_indices[:, 1], axis=0)
    x = jnp.concatenate([state_vec, e0, e1], axis=1)
    h1 = jnp.maximum(x @ model.w1 + model.b1, 0.0)
    h2 = jnp.maximum(h1 @ model.w2 + model.b2, 0.0)
    return h2 @ model.w3 + model.b3


if __name__ == "__main__":
    key = jax.random.PRNGKey(0)
    k_state, k_act, k_param = jax.random.split(key, 3)

    batch = 8
    state_dim = 32
    model = VectorRewardPredictorPallas(state_dim=state_dim,
                                        action_embed_dim=4,
                                        num_actions=6,
                                        hidden_dim=64,
                                        key=k_param)

    state_vec = jax.random.normal(k_state, (batch, state_dim),
                                  dtype=jnp.float32)
    action_indices = jax.random.randint(k_act, (batch, 2), 0,
                                        model.num_actions, dtype=jnp.int32)

    reward = model(state_vec, action_indices)
    reward = jax.block_until_ready(reward)
    assert reward.shape == (batch, 1)

    ref = _reference_forward(model, state_vec, action_indices)
    # bf16 operands at the MXU boundary (f32 accumulation) => loosened tolerance.
    assert jnp.allclose(reward, ref, atol=2e-2, rtol=2e-2), (
        jnp.max(jnp.abs(reward - ref)))

    # return_embedding=True path: passes the state vector through unchanged
    # (exactly what the PyTorch module does).
    emb = model(state_vec, action_indices, return_embedding=True)
    assert emb.shape == (batch, state_dim)

    print("KERNEL_OK")
</pallas_src>

<mosaic_0001>
module attributes {stable_mosaic.version = 11 : i64} {
  func.func @_reward_kernel(%arg0: i32, %arg1: memref<128x32xf32, #tpu.memory_space<vmem>>, %arg2: memref<128x2xi32, #tpu.memory_space<vmem>>, %arg3: memref<48x64xbf16, #tpu.memory_space<vmem>>, %arg4: memref<64x64xbf16, #tpu.memory_space<vmem>>, %arg5: memref<3x64xf32, #tpu.memory_space<vmem>>, %arg6: memref<1x128xf32, #tpu.memory_space<vmem>>) attributes {dimension_semantics = [#tpu.dimension_semantics<parallel>], iteration_bounds = array<i64: 1>, scalar_prefetch = 0 : i64, scratch_operands = 0 : i64, tpu.core_type = #tpu.core_type<tc>, window_params = [{transform_indices = @transform_0, window_bounds = array<i64: 128, 32>}, {transform_indices = @transform_1, window_bounds = array<i64: 128, 2>}, {pipeline_mode = #tpu.pipeline_mode<synchronous>, transform_indices = @transform_2, window_bounds = array<i64: 48, 64>}, {pipeline_mode = #tpu.pipeline_mode<synchronous>, transform_indices = @transform_3, window_bounds = array<i64: 64, 64>}, {pipeline_mode = #tpu.pipeline_mode<synchronous>, transform_indices = @transform_4, window_bounds = array<i64: 3, 64>}, {transform_indices = @transform_5, window_bounds = array<i64: 1, 128>}]} {
    %c0 = arith.constant 0 : index
    %c0_0 = arith.constant 0 : index
    %0 = vector.load %arg1[%c0, %c0_0] : memref<128x32xf32, #tpu.memory_space<vmem>>, vector<128x32xf32>
    %1 = arith.truncf %0 : vector<128x32xf32> to vector<128x32xbf16>
    %c0_1 = arith.constant 0 : index
    %c0_2 = arith.constant 0 : index
    %2 = vector.load %arg2[%c0_1, %c0_2] : memref<128x2xi32, #tpu.memory_space<vmem>>, vector<128x2xi32>
    %3 = tpu.iota {dimensions = array<i32: 1>} : vector<128x16xi32>
    %4 = vector.extract_strided_slice %2 {offsets = [0, 0], sizes = [128, 1], strides = [1, 1]} : vector<128x2xi32> to vector<128x1xi32>
    %5 = vector.broadcast %4 : vector<128x1xi32> to vector<128x16xi32>
    %6 = arith.cmpi eq, %3, %5 : vector<128x16xi32>
    %7 = vector.extract_strided_slice %2 {offsets = [0, 1], sizes = [128, 1], strides = [1, 1]} : vector<128x2xi32> to vector<128x1xi32>
    %c6_i32 = arith.constant 6 : i32
    %8 = vector.broadcast %c6_i32 : i32 to vector<128x1xi32>
    %9 = arith.addi %7, %8 : vector<128x1xi32>
    %10 = vector.broadcast %9 : vector<128x1xi32> to vector<128x16xi32>
    %11 = arith.cmpi eq, %3, %10 : vector<128x16xi32>
    %12 = arith.ori %6, %11 : vector<128x16xi1>
    %13 = arith.extui %12 : vector<128x16xi1> to vector<128x16xi32>
    %14 = arith.sitofp %13 : vector<128x16xi32> to vector<128x16xf32>
    %15 = arith.truncf %14 : vector<128x16xf32> to vector<128x16xbf16>
    %16 = tpu.concatenate %1, %15 in 1 : vector<128x32xbf16>, vector<128x16xbf16> -> vector<128x48xbf16>
    %c0_3 = arith.constant 0 : index
    %c0_4 = arith.constant 0 : index
    %17 = vector.load %arg3[%c0_3, %c0_4] : memref<48x64xbf16, #tpu.memory_space<vmem>>, vector<48x64xbf16>
    %cst = arith.constant dense<0.000000e+00> : vector<128x64xf32>
    %18 = tpu.matmul %16, %17, %cst {dimension_numbers = #tpu.dot_dimension_numbers<[1], [0], [0], [1], [0, 0, 1, 1], [], []>} : vector<128x48xbf16>, vector<48x64xbf16>, vector<128x64xf32> -> vector<128x64xf32>
    %cst_5 = arith.constant 0.000000e+00 : f32
    %19 = vector.broadcast %cst_5 : f32 to vector<128x64xf32>
    %20 = arith.maximumf %18, %19 : vector<128x64xf32>
    %c0_6 = arith.constant 0 : index
    %c0_7 = arith.constant 0 : index
    %21 = vector.load %arg5[%c0_6, %c0_7] : memref<3x64xf32, #tpu.memory_space<vmem>>, vector<3x64xf32>
    %22 = arith.truncf %20 : vector<128x64xf32> to vector<128x64xbf16>
    %c0_8 = arith.constant 0 : index
    %c0_9 = arith.constant 0 : index
    %23 = vector.load %arg4[%c0_8, %c0_9] : memref<64x64xbf16, #tpu.memory_space<vmem>>, vector<64x64xbf16>
    %cst_10 = arith.constant dense<0.000000e+00> : vector<128x64xf32>
    %24 = tpu.matmul %22, %23, %cst_10 {dimension_numbers = #tpu.dot_dimension_numbers<[1], [0], [0], [1], [0, 0, 1, 1], [], []>} : vector<128x64xbf16>, vector<64x64xbf16>, vector<128x64xf32> -> vector<128x64xf32>
    %25 = vector.extract_strided_slice %21 {offsets = [0, 0], sizes = [1, 64], strides = [1, 1]} : vector<3x64xf32> to vector<1x64xf32>
    %26 = vector.broadcast %25 : vector<1x64xf32> to vector<128x64xf32>
    %27 = arith.addf %24, %26 : vector<128x64xf32>
    %cst_11 = arith.constant 0.000000e+00 : f32
    %28 = vector.broadcast %cst_11 : f32 to vector<128x64xf32>
    %29 = arith.maximumf %27, %28 : vector<128x64xf32>
    %30 = vector.extract_strided_slice %21 {offsets = [1, 0], sizes = [1, 64], strides = [1, 1]} : vector<3x64xf32> to vector<1x64xf32>
    %31 = vector.broadcast %30 : vector<1x64xf32> to vector<128x64xf32>
    %32 = arith.mulf %29, %31 : vector<128x64xf32>
    %cst_12 = arith.constant dense<0.000000e+00> : vector<128xf32>
    %33 = vector.multi_reduction <add>, %32, %cst_12 [1] : vector<128x64xf32> to vector<128xf32>
    %34 = vector.shape_cast %33 : vector<128xf32> to vector<1x128xf32>
    %35 = vector.extract_strided_slice %21 {offsets = [2, 0], sizes = [1, 1], strides = [1, 1]} : vector<3x64xf32> to vector<1x1xf32>
    %36 = vector.broadcast %35 : vector<1x1xf32> to vector<1x128xf32>
    %37 = arith.addf %34, %36 : vector<1x128xf32>
    %c0_13 = arith.constant 0 : index
    %c0_14 = arith.constant 0 : index
    %38 = vector.load %arg6[%c0_13, %c0_14] : memref<1x128xf32, #tpu.memory_space<vmem>>, vector<1x128xf32>
    tpu.vector_store %arg6[%c0_13, %c0_14], %37 {strides = array<i32>} : memref<1x128xf32, #tpu.memory_space<vmem>>, vector<1x128xf32>,
    return
  }
  func.func @transform_0(%arg0: i32) -> (i32, i32) {
    %c0_i32 = arith.constant 0 : i32
    %c0_i32_0 = arith.constant 0 : i32
    return %arg0, %c0_i32 : i32, i32
  }
  func.func @transform_1(%arg0: i32) -> (i32, i32) {
    %c0_i32 = arith.constant 0 : i32
    %c0_i32_0 = arith.constant 0 : i32
    return %arg0, %c0_i32 : i32, i32
  }
  func.func @transform_2(%arg0: i32) -> (i32, i32) {
    %c0_i32 = arith.constant 0 : i32
    %c0_i32_0 = arith.constant 0 : i32
    %c0_i32_1 = arith.constant 0 : i32
    return %c0_i32, %c0_i32_0 : i32, i32
  }
  func.func @transform_3(%arg0: i32) -> (i32, i32) {
    %c0_i32 = arith.constant 0 : i32
    %c0_i32_0 = arith.constant 0 : i32
    %c0_i32_1 = arith.constant 0 : i32
    return %c0_i32, %c0_i32_0 : i32, i32
  }
  func.func @transform_4(%arg0: i32) -> (i32, i32) {
    %c0_i32 = arith.constant 0 : i32
    %c0_i32_0 = arith.constant 0 : i32
    %c0_i32_1 = arith.constant 0 : i32
    return %c0_i32, %c0_i32_0 : i32, i32
  }
  func.func @transform_5(%arg0: i32) -> (i32, i32) {
    %c0_i32 = arith.constant 0 : i32
    %c0_i32_0 = arith.constant 0 : i32
    return %arg0, %c0_i32 : i32, i32
  }
}

</mosaic_0001>

<bundles_post_ra>
// kernel: tpu_custom_call.1
= control target key start
LH: loop header
LB: loop body
LE: loop exit
PB: predicated region body
PF: predicated region fallthrough
CT: control target
= control target key end

     0   :  { %v996_v2 = vmov 0   ;;  %v997_v3 = vmov 1   ;;  %s1334_s0 = inlined_call_operand.vmem [shape: f32[128,32], index: 0, kind: input, shape index: {}]   ;;  %s1335_s1 = inlined_call_operand.vmem [shape: s32[128,2], index: 1, kind: input, shape index: {}]   ;;  %s1336_s2 = inlined_call_operand.vmem [shape: bf16[48,64], index: 2, kind: input, shape index: {}]   ;;  %s1337_s3 = inlined_call_operand.vmem [shape: bf16[64,64], index: 3, kind: input, shape index: {}]   ;;  %s1338_s4 = inlined_call_operand.vmem [shape: f32[3,64], index: 4, kind: input, shape index: {}]   ;;  %s1339_s5 = inlined_call_operand.hbm [shape: f32[1,128], index: 5, kind: output, shape index: {}]  }
   0x1   :  { %v54_v0 = vld [vmem:[%s1335_s1] sm:$0xff]  ;;  %v56_v1 = vld [vmem:[%s1335_s1 + $0x10] sm:$0xff]  ;;  %948 = vset.pattern.permute.xlu0 %v996_v2  ;;  %949 = vset.pattern.permute.xlu1 %v997_v3 }
   0x2   :  { %v136_v4 = vadd.s32 6, %v54_v0  ;;  %950 = vset.pattern.permute.xlu2 %v996_v2  ;;  %73 = vperm.xlu0 %948, %v54_v0  }
   0x3   :  { %10 = vsyncpa [#allocation3], 0  ;;  %79 = vperm.xlu2 %950, %v56_v1   ;;  %v55_v5 = vld [vmem:[%s1335_s1 + $0x8] sm:$0xff]  ;;  %v57_v7 = vld [vmem:[%s1335_s1 + $0x18] sm:$0xff]  ;;  %v138_v8 = vadd.s32 6, %v56_v1  ;;  %v70_v25 = vlaneseq  ;;  %v998_v33 = vmov 0.0  }
   0x4   :  { %153 = vperm.xlu1 %949, %v136_v4   ;;  %v137_v6 = vadd.s32 6, %v55_v5  ;;  %v139_v9 = vadd.s32 6, %v57_v7  ;;  %v58_v10 = vld [vmem:[%s1335_s1 + $0x20] sm:$0xff]  ;;  %v59_v11 = vld [vmem:[%s1335_s1 + $0x28] sm:$0xff]  ;;  %v60_v14 = vld [vmem:[%s1335_s1 + $0x30] sm:$0xff]  ;;  %s999_s19 = smov 32  }
   0x5   :  { %v141_v12 = vadd.s32 6, %v59_v11  ;;  %v140_v13 = vadd.s32 6, %v58_v10  ;;  %v142_v15 = vadd.s32 6, %v60_v14  ;;  %v61_v16 = vld [vmem:[%s1335_s1 + $0x38] sm:$0xff]  ;;  %v63_v18 = vld [vmem:[%s1335_s1 + $0x48] sm:$0xff]  ;;  %v62_v20 = vld [vmem:[%s1335_s1 + $0x40] sm:$0xff] }
   0x6   :  { %v143_v17 = vadd.s32 6, %v61_v16  ;;  %v145_v19 = vadd.s32 6, %v63_v18  ;;  %v1076_v21 = vld [vmem:[%s1335_s1 + $0x50] sm:$0xff]  ;;  %v65_v22 = vld [vmem:[%s1335_s1 + $0x58] sm:$0xff]  ;;  %v1084_v27 = vand.u32 127, %v70_v25  ;;  %v1091_v30 = vld [vmem:[%s1335_s1 + $0x68] sm:$0xff] }
   0x7   :  { %v147_v23 = vadd.s32 6, %v65_v22  ;;  %v149_v31 = vadd.s32 6, %v1091_v30  ;;  %v144_v48 = vadd.s32 6, %v62_v20  ;;  %v69_v54 = vld [vmem:[%s1335_s1 + $0x78] sm:$0xff]  ;;  %v146_v4 = vadd.s32 6, %v1076_v21  ;;  %s860_s22 = sshll.u32 %s1339_s5, 4  ;;  %s861_s22 = int_to_ptr.hbm [resolvable:$true] %s860_s22 }
   0xa   :  { %76 = vperm.xlu0 %948, %v55_v5  }
   0xb   :  { %82 = vperm.xlu2 %950, %v57_v7  }
   0xc   :  { %156 = vperm.xlu1 %949, %v137_v6  }
  0x12   :  { %951 = vset.pattern.permute.xlu0 %v997_v3 }
  0x13   :  { %85 = vperm.xlu2 %950, %v58_v10   ;;  %159 = vperm.xlu0 %951, %v138_v8   ;;  %v931_v10 = vld [vmem:[%s1336_s2 + $0x10] sm:$0xff] }
  0x14   :  { %162 = vperm.xlu1 %949, %v139_v9   ;;  %447 = vmatpush.bf16.msra.mxu0 %v931_v10 }
  0x15   :  { %936 = vmatpush.bf16.msra.mxu3 %v931_v10 }
  0x1b   :  { %953 = vset.pattern.permute.xlu2 %v997_v3  ;;  %168 = vperm.xlu0 %951, %v141_v12   ;;  %v66_v12 = vld [vmem:[%s1335_s1 + $0x60] sm:$0xff] }
  0x1c   :  { %952 = vset.pattern.permute.xlu1 %v996_v2  ;;  %165 = vperm.xlu2 %953, %v140_v13   ;;  %v930_v13 = vld [vmem:[%s1336_s2 + $0x8] sm:$0xff] }
  0x1d   :  { %88 = vperm.xlu1 %952, %v59_v11   ;;  %448 = vmatpush.bf16.msra.mxu0 %v930_v13 }
  0x1e   :  { %937 = vmatpush.bf16.msra.mxu3 %v930_v13 }
  0x23   :  { %171 = vperm.xlu0 %951, %v142_v15  }
  0x24   :  { %954 = vset.pattern.permute.xlu2 %v996_v2 }
  0x25   :  { %91 = vperm.xlu1 %952, %v60_v14   ;;  %94 = vperm.xlu2 %954, %v61_v16  }
  0x2b   :  { %956 = vset.pattern.permute.xlu0 %v996_v2 }
  0x2c   :  { %97 = vperm.xlu0 %956, %v62_v20  }
  0x2d   :  { %955 = vset.pattern.permute.xlu1 %v997_v3  ;;  %958 = vset.pattern.permute.xlu2 %v997_v3 }
  0x2e   :  { %174 = vperm.xlu1 %955, %v143_v17   ;;  %v929_v17 = vld [vmem:[%s1336_s2] sm:$0xff] }
  0x2f   :  { %449 = vmatpush.bf16.msra.mxu0 %v929_v17  ;;  %938 = vmatpush.bf16.msra.mxu3 %v929_v17 }
  0x34   :  { %103 = vperm.xlu0 %956, %v1076_v21   ;;  %v151_v21 = vadd.s32 6, %v69_v54 }
  0x36   :  { %957 = vset.pattern.permute.xlu1 %v996_v2 }
  0x37   :  { %100 = vperm.xlu1 %957, %v63_v18   ;;  %v68_v18 = vld [vmem:[%s1335_s1 + $0x70] sm:$0xff] }
  0x38   :  { %v150_v20 = vadd.s32 6, %v68_v18 }
  0x3c   :  { %961 = vset.pattern.permute.xlu0 %v997_v3 }
  0x3d   :  { %186 = vperm.xlu0 %961, %v147_v23   ;;  %v22_v23 = vld [vmem:[%s1334_s0] sm:$0xff] }
  0x3e   :  { %v38_v25 = vpack.c.bf16 %v22_v23, %v22_v23 }
  0x3f   :  { %959 = vset.pattern.permute.xlu1 %v997_v3 }
  0x40   :  { %180 = vperm.xlu1 %959, %v145_v19   ;;  %v148_v19 = vadd.s32 6, %v66_v12 }
  0x45   :  { %192 = vperm.xlu0 %961, %v149_v31  }
  0x48   :  { %960 = vset.pattern.permute.xlu1 %v996_v2 }
  0x49   :  { %106 = vperm.xlu1 %960, %v65_v22  }
  0x4d   :  { %965 = vset.pattern.permute.xlu0 %v996_v2 }
  0x4e   :  { %118 = vperm.xlu0 %965, %v69_v54  }
  0x5d   :  { %v80_v24 = vpop.permute.xlu2 %79 }
  0x5e   :  { %vm122_vm6 = vcmp.eq.s32.totalorder %v1084_v27, %v80_v24  ;;  %v23_v24 = vld [vmem:[%s1334_s0 + $0x8] sm:$0xff] }
  0x65   :  { %v83_v26 = vpop.permute.xlu2 %82 }
  0x66   :  { %vm123_vm8 = vcmp.eq.s32.totalorder %v1084_v27, %v83_v26  ;;  %v39_v26 = vpack.c.bf16 %v23_v24, %v23_v24 }
  0x6d   :  { %v86_v32 = vpop.permute.xlu2 %85 }
  0x6e   :  { %vm124_vm11 = vcmp.eq.s32.totalorder %v1084_v27, %v86_v32 }
  0x74   :  { %v74_v28 = vpop.permute.xlu0 %73 }
  0x75   :  { %vm120_vm0 = vcmp.eq.s32.totalorder %v1084_v27, %v74_v28 }
  0x76   :  { %v154_v29 = vpop.permute.xlu1 %153  ;;  %v166_v42 = vpop.permute.xlu2 %165 }
  0x77   :  { %vm200_vm1 = vcmp.eq.s32.totalorder %v1084_v27, %v154_v29  ;;  %vm204_vm12 = vcmp.eq.s32.totalorder %v1084_v27, %v166_v42  ;;  %v296_v29 = vunpack.c.l.b16 %v38_v25 }
  0x78   :  { %vm216_vm2 = vmor %vm120_vm0, %vm200_vm1 }
  0x79   :  { %v869_v34 = vsel %vm216_vm2, 1.0, %v998_v33  ;;  %vm220_vm14 = vmor %vm124_vm11, %vm204_vm12 }
  0x7a   :  { %v264_v37 = vpack.c.bf16 %v869_v34, %v869_v34  ;;  %v873_v52 = vsel %vm220_vm14, 1.0, %v998_v33 }
  0x7b   :  { %v268_v55 = vpack.c.bf16 %v873_v52, %v873_v52 }
  0x7c   :  { %v77_v35 = vpop.permute.xlu0 %76  ;;  %v336_v40 = vunpack.c.l.b16 %v264_v37 }
  0x7d   :  { %vm121_vm3 = vcmp.eq.s32.totalorder %v1084_v27, %v77_v35  ;;  %v340_v60 = vunpack.c.l.b16 %v268_v55  ;;  %v24_v35 = vld [vmem:[%s1334_s0 + $0x10] sm:$0xff] }
  0x7e   :  { %v157_v36 = vpop.permute.xlu1 %156 }
  0x7f   :  { %vm201_vm4 = vcmp.eq.s32.totalorder %v1084_v27, %v157_v36  ;;  %v95_v5 = vpop.permute.xlu2 %94  ;;  %v25_v36 = vld [vmem:[%s1334_s0 + $0x18] sm:$0xff] }
  0x80   :  { %vm217_vm5 = vmor %vm121_vm3, %vm201_vm4 }
  0x81   :  { %v870_v38 = vsel %vm217_vm5, 1.0, %v998_v33  ;;  %vm127_vm5 = vcmp.eq.s32.totalorder %v1084_v27, %v95_v5 }
  0x82   :  { %v265_v39 = vpack.c.bf16 %v870_v38, %v870_v38  ;;  %v40_v38 = vpack.c.bf16 %v24_v35, %v24_v35 }
  0x84   :  { %v337_v41 = vunpack.c.l.b16 %v265_v39  ;;  %v41_v39 = vpack.c.bf16 %v25_v36, %v25_v36  ;;  %v298_v42 = vunpack.c.l.b16 %v40_v38 }
  0x85   :  { %v160_v43 = vpop.permute.xlu0 %159 }
  0x86   :  { %v352_v44 = vpack.c.b16 %v337_v41, %v336_v40  ;;  %vm202_vm7 = vcmp.eq.s32.totalorder %v1084_v27, %v160_v43  ;;  %v163_v45 = vpop.permute.xlu1 %162  ;;  %v299_v43 = vunpack.c.l.b16 %v41_v39 }
  0x87   :  { %vm218_vm9 = vmor %vm122_vm6, %vm202_vm7  ;;  %vm203_vm10 = vcmp.eq.s32.totalorder %v1084_v27, %v163_v45 }
  0x88   :  { %360 = vrot.lane.b32.xlu2 %v352_v44, %s999_s19  ;;  %vm219_vm13 = vmor %vm123_vm8, %vm203_vm10  ;;  %v871_v46 = vsel %vm218_vm9, 1.0, %v998_v33  ;;  %vm376_vm8 = vcmask 261120   ;;  %vm425_vm10 = vcmask 392192  }
  0x89   :  { %v872_v47 = vsel %vm219_vm13, 1.0, %v998_v33  ;;  %v266_v49 = vpack.c.bf16 %v871_v46, %v871_v46 }
  0x8a   :  { %v267_v50 = vpack.c.bf16 %v872_v47, %v872_v47 }
  0x8b   :  { %v338_v56 = vunpack.c.l.b16 %v266_v49  ;;  %v313_v49 = vpack.c.b16 %v299_v43, %v298_v42  ;;  %v932_v42 = vld [vmem:[%s1337_s3] sm:$0xff]  ;;  %v32_v43 = vld [vmem:[%s1334_s0 + $0x50] sm:$0xff] }
  0x8c   :  { %v339_v57 = vunpack.c.l.b16 %v267_v50 }
  0x8d   :  { %v169_v51 = vpop.permute.xlu0 %168 }
  0x8e   :  { %vm205_vm15 = vcmp.eq.s32.totalorder %v1084_v27, %v169_v51  ;;  %v353_v62 = vpack.c.b16 %v339_v57, %v338_v56 }
  0x8f   :  { %v89_v53 = vpop.permute.xlu1 %88 }
  0x90   :  { %177 = vperm.xlu2 %958, %v144_v48   ;;  %vm125_vm0 = vcmp.eq.s32.totalorder %v1084_v27, %v89_v53 }
  0x91   :  { %vm221_vm1 = vmor %vm125_vm0, %vm205_vm15 }
  0x92   :  { %v874_v58 = vsel %vm221_vm1, 1.0, %v998_v33 }
  0x93   :  { %v269_v59 = vpack.c.bf16 %v874_v58, %v874_v58 }
  0x95   :  { %v341_v61 = vunpack.c.l.b16 %v269_v59  ;;  %v172_v63 = vpop.permute.xlu0 %171 }
  0x96   :  { %vm206_vm2 = vcmp.eq.s32.totalorder %v1084_v27, %v172_v63 }
  0x97   :  { %v92_v0 = vpop.permute.xlu1 %91  ;;  %v354_v1 = vpack.c.b16 %v341_v61, %v340_v60  ;;  %v26_v60 = vld [vmem:[%s1334_s0 + $0x20] sm:$0xff]  ;;  %v27_v61 = vld [vmem:[%s1334_s0 + $0x28] sm:$0xff] }
  0x98   :  { %362 = vrot.lane.b32.xlu2 %v353_v62, %s999_s19  ;;  %vm126_vm3 = vcmp.eq.s32.totalorder %v1084_v27, %v92_v0  ;;  %v42_v63 = vpack.c.bf16 %v26_v60, %v26_v60  ;;  %v43_v0 = vpack.c.bf16 %v27_v61, %v27_v61 }
  0x99   :  { %364 = vrot.lane.b32.xlu1 %v354_v1, %s999_s19  ;;  %vm222_vm4 = vmor %vm126_vm3, %vm206_vm2 }
  0x9a   :  { %v875_v6 = vsel %vm222_vm4, 1.0, %v998_v33  ;;  %v300_v5 = vunpack.c.l.b16 %v42_v63 }
  0x9b   :  { %v270_v8 = vpack.c.bf16 %v875_v6, %v875_v6  ;;  %v301_v6 = vunpack.c.l.b16 %v43_v0 }
  0x9d   :  { %v342_v14 = vunpack.c.l.b16 %v270_v8 }
  0x9e   :  { %v98_v28 = vpop.permute.xlu0 %97 }
  0x9f   :  { %vm128_vm13 = vcmp.eq.s32.totalorder %v1084_v27, %v98_v28 }
  0xa0   :  { %183 = vperm.xlu2 %958, %v146_v4   ;;  %v175_v7 = vpop.permute.xlu1 %174 }
  0xa1   :  { %vm207_vm6 = vcmp.eq.s32.totalorder %v1084_v27, %v175_v7  ;;  %112 = vperm.xlu1 %960, %v1091_v30   ;;  %v297_v30 = vunpack.c.l.b16 %v39_v26  ;;  %v314_v7 = vpack.c.b16 %v301_v6, %v300_v5 }
  0xa2   :  { %vm223_vm7 = vmor %vm127_vm5, %vm207_vm6 }
  0xa3   :  { %v876_v9 = vsel %vm223_vm7, 1.0, %v998_v33  ;;  %v312_v32 = vpack.c.b16 %v297_v30, %v296_v29 }
  0xa4   :  { %v271_v11 = vpack.c.bf16 %v876_v9, %v876_v9 }
  0xa6   :  { %v343_v15 = vunpack.c.l.b16 %v271_v11  ;;  %v104_v34 = vpop.permute.xlu0 %103  ;;  %v28_v11 = vld [vmem:[%s1334_s0 + $0x30] sm:$0xff] }
  0xa7   :  { %vm130_vm3 = vcmp.eq.s32.totalorder %v1084_v27, %v104_v34 }
  0xa8   :  { %962 = vset.pattern.permute.xlu2 %v996_v2  ;;  %v355_v16 = vpack.c.b16 %v343_v15, %v342_v14  ;;  %v44_v14 = vpack.c.bf16 %v28_v11, %v28_v11 }
  0xa9   :  { %109 = vperm.xlu2 %962, %v66_v12   ;;  %966 = vset.pattern.permute.xlu1 %v997_v3  ;;  %v101_v22 = vpop.permute.xlu1 %100  ;;  %v29_v12 = vld [vmem:[%s1334_s0 + $0x38] sm:$0xff] }
  0xaa   :  { %366 = vrot.lane.b32.xlu1 %v355_v16, %s999_s19  ;;  %vm129_vm9 = vcmp.eq.s32.totalorder %v1084_v27, %v101_v22  ;;  %v45_v15 = vpack.c.bf16 %v29_v12, %v29_v12 }
  0xaf   :  { %v187_v47 = vpop.permute.xlu0 %186 }
  0xb0   :  { %vm211_vm0 = vcmp.eq.s32.totalorder %v1084_v27, %v187_v47 }
  0xb1   :  { %963 = vset.pattern.permute.xlu2 %v997_v3 }
  0xb2   :  { %189 = vperm.xlu2 %963, %v148_v19   ;;  %195 = vperm.xlu1 %966, %v150_v20   ;;  %v181_v31 = vpop.permute.xlu1 %180  ;;  %v302_v20 = vunpack.c.l.b16 %v44_v14 }
  0xb3   :  { %vm209_vm11 = vcmp.eq.s32.totalorder %v1084_v27, %v181_v31 }
  0xb4   :  { %vm225_vm12 = vmor %vm129_vm9, %vm209_vm11 }
  0xb5   :  { %v878_v37 = vsel %vm225_vm12, 1.0, %v998_v33 }
  0xb6   :  { %v273_v41 = vpack.c.bf16 %v878_v37, %v878_v37 }
  0xb7   :  { %v193_v13 = vpop.permute.xlu0 %192 }
  0xb8   :  { %v345_v46 = vunpack.c.l.b16 %v273_v41  ;;  %vm213_vm11 = vcmp.eq.s32.totalorder %v1084_v27, %v193_v13  ;;  %v934_v41 = vld [vmem:[%s1337_s3 + $0x10] sm:$0xff] }
  0xba   :  { %964 = vset.pattern.permute.xlu2 %v996_v2  ;;  %969 = vset.pattern.permute.xlu1 %v996_v2 }
  0xbb   :  { %115 = vperm.xlu2 %964, %v68_v18   ;;  %v107_v48 = vpop.permute.xlu1 %106 }
  0xbc   :  { %vm131_vm1 = vcmp.eq.s32.totalorder %v1084_v27, %v107_v48 }
  0xbd   :  { %vm227_vm2 = vmor %vm131_vm1, %vm211_vm0 }
  0xbe   :  { %v880_v54 = vsel %vm227_vm2, 1.0, %v998_v33 }
  0xbf   :  { %v275_v56 = vpack.c.bf16 %v880_v54, %v880_v54 }
  0xc0   :  { %v119_v28 = vpop.permute.xlu0 %118 }
  0xc1   :  { %v347_v59 = vunpack.c.l.b16 %v275_v56 }
  0xc3   :  { %967 = vset.pattern.permute.xlu2 %v997_v3 }
  0xc4   :  { %198 = vperm.xlu2 %967, %v151_v21   ;;  %v303_v21 = vunpack.c.l.b16 %v45_v15  ;;  %v507_v15 = vld [vmem:[%s1338_s4] sm:$0x7] }
  0xc6   :  { %v315_v26 = vpack.c.b16 %v303_v21, %v302_v20  ;;  %v36_v21 = vld [vmem:[%s1334_s0 + $0x70] sm:$0xff] }
  0xcc   :  { %968 = vset.pattern.permute.xlu2 %v996_v2 }
  0xe2   :  { %v361_v2 = vpop.permute.xlu2 %360 }
  0xe3   :  { %v379_v3 = vsel %vm376_vm8, %v312_v32, %v361_v2 }
  0xe4   :  { %897 = vmatmul.msk.bf16.vlgmr.msra.gmra.mxu0 %vm425_vm10, %v379_v3 }
  0xea   :  { %v178_v40 = vpop.permute.xlu2 %177 }
  0xeb   :  { %vm208_vm14 = vcmp.eq.s32.totalorder %v1084_v27, %v178_v40  ;;  %v935_v40 = vld [vmem:[%s1337_s3 + $0x18] sm:$0xff] }
  0xec   :  { %vm224_vm15 = vmor %vm128_vm13, %vm208_vm14  ;;  %vm135_vm14 = vcmp.eq.s32.totalorder %v1084_v27, %v119_v28  ;;  %578 = vmatpush.bf16.msra.mxu1 %v935_v40  ;;  %939 = vmatpush.bf16.msra.mxu2 %v935_v40 }
  0xed   :  { %v877_v44 = vsel %vm224_vm15, 1.0, %v998_v33 }
  0xee   :  { %v272_v45 = vpack.c.bf16 %v877_v44, %v877_v44  ;;  %v33_v44 = vld [vmem:[%s1334_s0 + $0x58] sm:$0xff] }
  0xf0   :  { %v344_v50 = vunpack.c.l.b16 %v272_v45  ;;  %579 = vmatpush.bf16.msra.mxu1 %v934_v41  ;;  %940 = vmatpush.bf16.msra.mxu2 %v934_v41  ;;  %v48_v45 = vpack.c.bf16 %v32_v43, %v32_v43  ;;  %v1261_v41 = vperm.slane %v507_v15, 1 }
  0xf2   :  { %v363_v51 = vpop.permute.xlu2 %362  ;;  %v356_v52 = vpack.c.b16 %v345_v46, %v344_v50  ;;  %v49_v46 = vpack.c.bf16 %v33_v44, %v33_v44  ;;  %v306_v47 = vunpack.c.l.b16 %v48_v45  ;;  %v31_v50 = vld [vmem:[%s1334_s0 + $0x48] sm:$0xff] }
  0xf3   :  { %v382_v53 = vsel %vm376_vm8, %v313_v49, %v363_v51  ;;  %v30_v49 = vld [vmem:[%s1334_s0 + $0x40] sm:$0xff] }
  0xf4   :  { %368 = vrot.lane.b32.xlu1 %v356_v52, %s999_s19  ;;  %898 = vmatmul.msk.bf16.gmra.mxu0 %vm425_vm10, %v382_v53  ;;  %v307_v48 = vunpack.c.l.b16 %v49_v46  ;;  %v46_v52 = vpack.c.bf16 %v30_v49, %v30_v49  ;;  %v47_v53 = vpack.c.bf16 %v31_v50, %v31_v50 }
  0xf6   :  { %v317_v51 = vpack.c.b16 %v307_v48, %v306_v47  ;;  %v304_v56 = vunpack.c.l.b16 %v46_v52 }
  0xfa   :  { %v184_v55 = vpop.permute.xlu2 %183 }
  0xfb   :  { %vm210_vm4 = vcmp.eq.s32.totalorder %v1084_v27, %v184_v55 }
  0xfc   :  { %vm226_vm5 = vmor %vm130_vm3, %vm210_vm4  ;;  %vm549_vm4 = vcmask 523264  }
  0xfd   :  { %v879_v57 = vsel %vm226_vm5, 1.0, %v998_v33  ;;  %vm801_vm5 = vcmask 261312  }
  0xfe   :  { %v274_v58 = vpack.c.bf16 %v879_v57, %v879_v57  ;;  %v305_v57 = vunpack.c.l.b16 %v47_v53 }
 0x100   :  { %v346_v62 = vunpack.c.l.b16 %v274_v58 }
 0x102   :  { %v357_v1 = vpack.c.b16 %v347_v59, %v346_v62  ;;  %v316_v59 = vpack.c.b16 %v305_v57, %v304_v56 }
 0x103   :  { %v110_v4 = vpop.permute.xlu2 %109 }
 0x104   :  { %370 = vrot.lane.b32.xlu2 %v357_v1, %s999_s19  ;;  %vm132_vm7 = vcmp.eq.s32.totalorder %v1084_v27, %v110_v4 }
 0x10b   :  { %v365_v8 = vpop.permute.xlu1 %364 }
 0x10c   :  { %v190_v9 = vpop.permute.xlu2 %189  ;;  %v385_v10 = vsel %vm376_vm8, %v314_v7, %v365_v8  ;;  %706 = vperm.xlu2 %968, %v507_v15  }
 0x10d   :  { %vm212_vm6 = vcmp.eq.s32.totalorder %v1084_v27, %v190_v9  ;;  %899 = vmatmul.msk.bf16.gmra.mxu0 %vm425_vm10, %v385_v10  ;;  %v34_v9 = vld [vmem:[%s1334_s0 + $0x60] sm:$0xff]  ;;  %v35_v10 = vld [vmem:[%s1334_s0 + $0x68] sm:$0xff] }
 0x10e   :  { %vm228_vm9 = vmor %vm132_vm7, %vm212_vm6  ;;  %v50_v11 = vpack.c.bf16 %v34_v9, %v34_v9  ;;  %v51_v12 = vpack.c.bf16 %v35_v10, %v35_v10  ;;  %vm805_vm6 = vcmask 326912   ;;  %vm809_vm7 = vcmask 392512  }
 0x10f   :  { %v881_v16 = vsel %vm228_vm9, 1.0, %v998_v33  ;;  %vm813_vm9 = vcmask 458112  }
 0x110   :  { %v276_v19 = vpack.c.bf16 %v881_v16, %v881_v16  ;;  %v308_v13 = vunpack.c.l.b16 %v50_v11  ;;  %v309_v14 = vunpack.c.l.b16 %v51_v12 }
 0x112   :  { %v348_v24 = vunpack.c.l.b16 %v276_v19 }
 0x113   :  { %v113_v17 = vpop.permute.xlu1 %112 }
 0x114   :  { %vm133_vm12 = vcmp.eq.s32.totalorder %v1084_v27, %v113_v17  ;;  %v318_v17 = vpack.c.b16 %v309_v14, %v308_v13 }
 0x115   :  { %v116_v18 = vpop.permute.xlu2 %115  ;;  %vm229_vm13 = vmor %vm133_vm12, %vm213_vm11  ;;  %vm817_vm11 = vcmask 523712   ;;  %vm821_vm12 = vcmask 589312  }
 0x116   :  { %v882_v22 = vsel %vm229_vm13, 1.0, %v998_v33  ;;  %vm134_vm1 = vcmp.eq.s32.totalorder %v1084_v27, %v116_v18  ;;  %vm825_vm13 = vcmask 654912  }
 0x117   :  { %v277_v23 = vpack.c.bf16 %v882_v22, %v882_v22  ;;  %v37_v22 = vld [vmem:[%s1334_s0 + $0x78] sm:$0xff]  ;;  %s1000_s0 = smov [#allocation2]  }
 0x118   :  { %v53_v28 = vpack.c.bf16 %v37_v22, %v37_v22  ;;  %s858_s4 = sshll.u32 %s1000_s0, 4  ;;  %s859_s4 = int_to_ptr.vmem [resolvable:$true] %s858_s4 }
 0x119   :  { %v349_v25 = vunpack.c.l.b16 %v277_v23 }
 0x11b   :  { %v358_v29 = vpack.c.b16 %v349_v25, %v348_v24 }
 0x11c   :  { %v367_v30 = vpop.permute.xlu1 %366 }
 0x11d   :  { %372 = vrot.lane.b32.xlu0 %v358_v29, %s999_s19  ;;  %v388_v31 = vsel %vm376_vm8, %v315_v26, %v367_v30  ;;  %v52_v26 = vpack.c.bf16 %v36_v21, %v36_v21  ;;  %v311_v30 = vunpack.c.l.b16 %v53_v28 }
 0x11e   :  { %v199_v32 = vpop.permute.xlu2 %198  ;;  %900 = vmatmul.msk.bf16.gmra.mxu0 %vm425_vm10, %v388_v31 }
 0x11f   :  { %vm215_vm15 = vcmp.eq.s32.totalorder %v1084_v27, %v199_v32  ;;  %v310_v29 = vunpack.c.l.b16 %v52_v26 }
 0x120   :  { %vm231_vm0 = vmor %vm135_vm14, %vm215_vm15  ;;  %vm829_vm14 = vcmask 720512   ;;  %vm833_vm15 = vcmask 786112  }
 0x121   :  { %v884_v2 = vsel %vm231_vm0, 1.0, %v998_v33  ;;  %v319_v32 = vpack.c.b16 %v311_v30, %v310_v29  ;;  %vm837_vm0 = vcmask 851712  }
 0x122   :  { %v279_v3 = vpack.c.bf16 %v884_v2, %v884_v2 }
 0x124   :  { %v196_v34 = vpop.permute.xlu1 %195  ;;  %v351_v36 = vunpack.c.l.b16 %v279_v3 }
 0x125   :  { %vm214_vm2 = vcmp.eq.s32.totalorder %v1084_v27, %v196_v34 }
 0x126   :  { %vm230_vm3 = vmor %vm134_vm1, %vm214_vm2  ;;  %vm841_vm1 = vcmask 917312   ;;  %vm845_vm2 = vcmask 982912  }
 0x127   :  { %v883_v35 = vsel %vm230_vm3, 1.0, %v998_v33  ;;  %v933_v33 = vld [vmem:[%s1337_s3 + $0x8] sm:$0xff]  ;;  %vm849_vm3 = vcmask 1048512  }
 0x128   :  { %v278_v37 = vpack.c.bf16 %v883_v35, %v883_v35  ;;  %580 = vmatpush.bf16.msra.mxu1 %v933_v33  ;;  %941 = vmatpush.bf16.msra.mxu2 %v933_v33 }
 0x12a   :  { %v350_v38 = vunpack.c.l.b16 %v278_v37 }
 0x12c   :  { %v359_v39 = vpack.c.b16 %v351_v36, %v350_v38  ;;  %581 = vmatpush.bf16.msra.mxu1 %v932_v42  ;;  %942 = vmatpush.bf16.msra.mxu2 %v932_v42 }
 0x12e   :  { %374 = vrot.lane.b32.xlu1 %v359_v39, %s999_s19  ;;  %v1259_v39 = vperm.slane %v507_v15, 0 }
 0x15e   :  { %v371_v54 = vpop.permute.xlu2 %370 }
 0x15f   :  { %v394_v55 = vsel %vm376_vm8, %v317_v51, %v371_v54 }
 0x160   :  { %902 = vmatmul.msk.bf16.vlgmr.msra.gmra.mxu3 %vm425_vm10, %v394_v55 }
 0x161   :  { %v451_v58 = vpop.f32.mrf.mxu0 }
 0x162   :  { %v491_v63 = vmax.f32 %v451_v58, 0.0 }
 0x166   :  { %v369_v60 = vpop.permute.xlu1 %368 }
 0x167   :  { %v391_v61 = vsel %vm376_vm8, %v316_v59, %v369_v60 }
 0x168   :  { %901 = vmatmul.msk.bf16.gmra.mxu0 %vm425_vm10, %v391_v61 }
 0x169   :  { %v453_v62 = vpop.f32.mrf.mxu0 }
 0x16a   :  { %v492_v0 = vmax.f32 %v453_v62, 0.0 }
 0x16c   :  { %v508_v1 = vpack.c.bf16 %v492_v0, %v491_v63 }
 0x16e   :  { %921 = vmatmul.msk.bf16.vlgmr.msra.gmra.mxu1 %vm549_vm4, %v508_v1 }
 0x171   :  { %v456_v4 = vpop.f32.mrf.mxu0 }
 0x172   :  { %v493_v6 = vmax.f32 %v456_v4, 0.0 }
 0x179   :  { %v458_v5 = vpop.f32.mrf.mxu0 }
 0x17a   :  { %v494_v7 = vmax.f32 %v458_v5, 0.0 }
 0x17c   :  { %v509_v8 = vpack.c.bf16 %v494_v7, %v493_v6 }
 0x17e   :  { %922 = vmatmul.msk.bf16.gmra.mxu1 %vm549_vm4, %v509_v8 }
 0x18a   :  { %v461_v16 = vpop.f32.mrf.mxu0 }
 0x18b   :  { %v495_v23 = vmax.f32 %v461_v16, 0.0 }
 0x18f   :  { %v373_v18 = vpop.permute.xlu0 %372 }
 0x190   :  { %v397_v19 = vsel %vm376_vm8, %v318_v17, %v373_v18 }
 0x191   :  { %903 = vmatmul.msk.bf16.gmra.mxu3 %vm425_vm10, %v397_v19 }
 0x192   :  { %v463_v20 = vpop.f32.mrf.mxu0 }
 0x193   :  { %v496_v24 = vmax.f32 %v463_v20, 0.0 }
 0x195   :  { %v510_v25 = vpack.c.bf16 %v496_v24, %v495_v23 }
 0x197   :  { %923 = vmatmul.msk.bf16.gmra.mxu1 %vm549_vm4, %v510_v25 }
 0x19b   :  { %v466_v31 = vpop.f32.mrf.mxu0 }
 0x19c   :  { %v497_v35 = vmax.f32 %v466_v31, 0.0 }
 0x1a0   :  { %v375_v2 = vpop.permute.xlu1 %374 }
 0x1a1   :  { %v400_v3 = vsel %vm376_vm8, %v319_v32, %v375_v2  ;;  %vm793_vm8 = vcmask 130112  }
 0x1a2   :  { %904 = vmatmul.msk.bf16.gmra.mxu3 %vm425_vm10, %v400_v3  ;;  %vm797_vm10 = vcmask 195712  }
 0x1a3   :  { %v468_v34 = vpop.f32.mrf.mxu0 }
 0x1a4   :  { %v498_v36 = vmax.f32 %v468_v34, 0.0 }
 0x1a6   :  { %v511_v37 = vpack.c.bf16 %v498_v36, %v497_v35 }
 0x1a8   :  { %924 = vmatmul.msk.bf16.gmra.mxu1 %vm549_vm4, %v511_v37 }
 0x1e3   :  { %v476_v46 = vpop.f32.mrf.mxu3 }
 0x1e4   :  { %v501_v59 = vmax.f32 %v476_v46, 0.0 }
 0x1e5   :  { %v471_v38 = vpop.f32.mrf.mxu0 }
 0x1e6   :  { %v499_v43 = vmax.f32 %v471_v38, 0.0 }
 0x1eb   :  { %v583_v40 = vpop.f32.mrf.mxu1  ;;  %v478_v54 = vpop.f32.mrf.mxu3 }
 0x1ec   :  { %v584_v33 = vadd.f32 %v583_v40, %v1259_v39  ;;  %v502_v57 = vmax.f32 %v478_v54, 0.0 }
 0x1ed   :  { %v473_v42 = vpop.f32.mrf.mxu0 }
 0x1ee   :  { %v623_v44 = vmax.f32 %v584_v33, 0.0  ;;  %v500_v45 = vmax.f32 %v473_v42, 0.0  ;;  %v513_v61 = vpack.c.bf16 %v502_v57, %v501_v59 }
 0x1f0   :  { %v512_v47 = vpack.c.bf16 %v500_v45, %v499_v43  ;;  %v640_v48 = vmul.f32 %v1261_v41, %v623_v44 }
 0x1f2   :  { %925 = vmatmul.msk.bf16.vlgmr.msra.gmra.mxu2 %vm549_vm4, %v512_v47  ;;  %v656_v49 = vsel %vm549_vm4, %v640_v48, 0.0 }
 0x1f3   :  { %v585_v50 = vpop.f32.mrf.mxu1  ;;  %657 = vadd.xlane.f32.xlu2 %v656_v49 }
 0x1f4   :  { %v586_v51 = vadd.f32 %v585_v50, %v1259_v39 }
 0x1f6   :  { %v624_v52 = vmax.f32 %v586_v51, 0.0 }
 0x1f8   :  { %v641_v53 = vmul.f32 %v1261_v41, %v624_v52 }
 0x1fa   :  { %v659_v55 = vsel %vm549_vm4, %v641_v53, 0.0 }
 0x1fb   :  { %660 = vadd.xlane.f32.xlu0 %v659_v55  ;;  %v588_v56 = vpop.f32.mrf.mxu1 }
 0x1fc   :  { %v589_v58 = vadd.f32 %v588_v56, %v1259_v39 }
 0x1fe   :  { %v625_v60 = vmax.f32 %v589_v58, 0.0 }
 0x200   :  { %v642_v62 = vmul.f32 %v1261_v41, %v625_v60 }
 0x202   :  { %926 = vmatmul.msk.bf16.gmra.mxu2 %vm549_vm4, %v513_v61  ;;  %v662_v63 = vsel %vm549_vm4, %v642_v62, 0.0 }
 0x203   :  { %v590_v0 = vpop.f32.mrf.mxu1  ;;  %663 = vadd.xlane.f32.xlu1 %v662_v63 }
 0x204   :  { %v591_v1 = vadd.f32 %v590_v0, %v1259_v39 }
 0x206   :  { %v626_v4 = vmax.f32 %v591_v1, 0.0 }
 0x208   :  { %v643_v5 = vmul.f32 %v1261_v41, %v626_v4 }
 0x20a   :  { %v665_v6 = vsel %vm549_vm4, %v643_v5, 0.0 }
 0x20b   :  { %666 = vadd.xlane.f32.xlu2 %v665_v6  ;;  %v707_v6 = vpop.permute.xlu2 %706 }
 0x214   :  { %v481_v7 = vpop.f32.mrf.mxu3  ;;  %v593_v8 = vpop.f32.mrf.mxu1 }
 0x215   :  { %v594_v9 = vadd.f32 %v593_v8, %v1259_v39  ;;  %v503_v15 = vmax.f32 %v481_v7, 0.0 }
 0x217   :  { %v627_v10 = vmax.f32 %v594_v9, 0.0 }
 0x219   :  { %v644_v11 = vmul.f32 %v1261_v41, %v627_v10 }
 0x21b   :  { %v668_v12 = vsel %vm549_vm4, %v644_v11, 0.0 }
 0x21c   :  { %v483_v13 = vpop.f32.mrf.mxu3  ;;  %v595_v14 = vpop.f32.mrf.mxu1  ;;  %669 = vadd.xlane.f32.xlu2 %v668_v12 }
 0x21d   :  { %v504_v16 = vmax.f32 %v483_v13, 0.0  ;;  %v596_v17 = vadd.f32 %v595_v14, %v1259_v39 }
 0x21f   :  { %v514_v18 = vpack.c.bf16 %v504_v16, %v503_v15  ;;  %v628_v19 = vmax.f32 %v596_v17, 0.0 }
 0x221   :  { %927 = vmatmul.msk.bf16.gmra.mxu2 %vm549_vm4, %v514_v18  ;;  %v645_v20 = vmul.f32 %v1261_v41, %v628_v19 }
 0x223   :  { %v671_v21 = vsel %vm549_vm4, %v645_v20, 0.0  ;;  %v708_v20 = vperm.slane %v707_v6, 2  ;;  %v807_v6 = vadd.s32 4294967256, %v1084_v27 }
 0x224   :  { %672 = vadd.xlane.f32.xlu0 %v671_v21 }
 0x225   :  { %v486_v22 = vpop.f32.mrf.mxu3  ;;  %v598_v23 = vpop.f32.mrf.mxu1 }
 0x226   :  { %v599_v24 = vadd.f32 %v598_v23, %v1259_v39  ;;  %v505_v31 = vmax.f32 %v486_v22, 0.0 }
 0x228   :  { %v629_v25 = vmax.f32 %v599_v24, 0.0 }
 0x22a   :  { %v646_v26 = vmul.f32 %v1261_v41, %v629_v25 }
 0x22c   :  { %v674_v28 = vsel %vm549_vm4, %v646_v26, 0.0 }
 0x22d   :  { %v488_v29 = vpop.f32.mrf.mxu3  ;;  %v600_v30 = vpop.f32.mrf.mxu1  ;;  %675 = vadd.xlane.f32.xlu1 %v674_v28 }
 0x22e   :  { %v506_v32 = vmax.f32 %v488_v29, 0.0  ;;  %v601_v2 = vadd.f32 %v600_v30, %v1259_v39 }
 0x230   :  { %v515_v3 = vpack.c.bf16 %v506_v32, %v505_v31  ;;  %v630_v34 = vmax.f32 %v601_v2, 0.0 }
 0x232   :  { %928 = vmatmul.msk.bf16.gmra.mxu2 %vm549_vm4, %v515_v3  ;;  %v647_v35 = vmul.f32 %v1261_v41, %v630_v34 }
 0x234   :  { %v677_v36 = vsel %vm549_vm4, %v647_v35, 0.0 }
 0x235   :  { %678 = vadd.xlane.f32.xlu2 %v677_v36 }
 0x266   :  { %v658_v14 = vpop.xlane.xlu2 %657 }
 0x267   :  { %v710_v22 = vadd.f32 %v708_v20, %v658_v14 }
 0x26e   :  { %v661_v25 = vpop.xlane.xlu0 %660 }
 0x275   :  { %v603_v37 = vpop.f32.mrf.mxu2 }
 0x276   :  { %v604_v38 = vadd.f32 %v603_v37, %v1259_v39  ;;  %v664_v18 = vpop.xlane.xlu1 %663 }
 0x277   :  { %v712_v26 = vadd.f32 %v708_v20, %v664_v18 }
 0x278   :  { %v631_v40 = vmax.f32 %v604_v38, 0.0 }
 0x27a   :  { %v648_v33 = vmul.f32 %v1261_v41, %v631_v40 }
 0x27c   :  { %v680_v42 = vsel %vm549_vm4, %v648_v33, 0.0 }
 0x27d   :  { %v605_v43 = vpop.f32.mrf.mxu2  ;;  %681 = vadd.xlane.f32.xlu0 %v680_v42 }
 0x27e   :  { %v606_v44 = vadd.f32 %v605_v43, %v1259_v39  ;;  %v667_v19 = vpop.xlane.xlu2 %666 }
 0x27f   :  { %v713_v21 = vadd.f32 %v708_v20, %v667_v19 }
 0x280   :  { %v632_v45 = vmax.f32 %v606_v44, 0.0 }
 0x282   :  { %v649_v46 = vmul.f32 %v1261_v41, %v632_v45 }
 0x284   :  { %v683_v47 = vsel %vm549_vm4, %v649_v46, 0.0 }
 0x285   :  { %v608_v48 = vpop.f32.mrf.mxu2  ;;  %684 = vadd.xlane.f32.xlu1 %v683_v47 }
 0x286   :  { %v609_v49 = vadd.f32 %v608_v48, %v1259_v39 }
 0x288   :  { %v633_v50 = vmax.f32 %v609_v49, 0.0 }
 0x28a   :  { %v650_v51 = vmul.f32 %v1261_v41, %v633_v50 }
 0x28c   :  { %v686_v52 = vsel %vm549_vm4, %v650_v51, 0.0 }
 0x28d   :  { %v610_v53 = vpop.f32.mrf.mxu2  ;;  %687 = vadd.xlane.f32.xlu2 %v686_v52 }
 0x28e   :  { %v611_v54 = vadd.f32 %v610_v53, %v1259_v39 }
 0x28f   :  { %v670_v29 = vpop.xlane.xlu2 %669 }
 0x290   :  { %v634_v55 = vmax.f32 %v611_v54, 0.0  ;;  %v714_v30 = vadd.f32 %v708_v20, %v670_v29  ;;  %v791_v54 = vadd.s32 4294967288, %v1084_v27 }
 0x292   :  { %v651_v56 = vmul.f32 %v1261_v41, %v634_v55 }
 0x294   :  { %v689_v57 = vsel %vm549_vm4, %v651_v56, 0.0 }
 0x295   :  { %690 = vadd.xlane.f32.xlu0 %v689_v57  ;;  %v795_v57 = vadd.s32 4294967280, %v1084_v27 }
 0x297   :  { %v673_v28 = vpop.xlane.xlu0 %672 }
 0x2a0   :  { %v676_v23 = vpop.xlane.xlu1 %675 }
 0x2a1   :  { %v716_v24 = vadd.f32 %v708_v20, %v676_v23 }
 0x2a4   :  { %v613_v58 = vpop.f32.mrf.mxu2 }
 0x2a5   :  { %v614_v59 = vadd.f32 %v613_v58, %v1259_v39 }
 0x2a7   :  { %v635_v60 = vmax.f32 %v614_v59, 0.0 }
 0x2a8   :  { %v679_v31 = vpop.xlane.xlu2 %678 }
 0x2a9   :  { %v652_v61 = vmul.f32 %v1261_v41, %v635_v60  ;;  %v717_v32 = vadd.f32 %v708_v20, %v679_v31  ;;  %v803_v60 = vadd.s32 4294967264, %v1084_v27  ;;  %v835_v31 = vadd.s32 4294967200, %v1084_v27 }
 0x2ab   :  { %v692_v62 = vsel %vm549_vm4, %v652_v61, 0.0  ;;  %v799_v61 = vadd.s32 4294967272, %v1084_v27 }
 0x2ac   :  { %v615_v63 = vpop.f32.mrf.mxu2  ;;  %693 = vadd.xlane.f32.xlu1 %v692_v62 }
 0x2ad   :  { %v616_v0 = vadd.f32 %v615_v63, %v1259_v39 }
 0x2af   :  { %v636_v1 = vmax.f32 %v616_v0, 0.0 }
 0x2b1   :  { %v653_v4 = vmul.f32 %v1261_v41, %v636_v1 }
 0x2b3   :  { %v695_v5 = vsel %vm549_vm4, %v653_v4, 0.0 }
 0x2b4   :  { %696 = vadd.xlane.f32.xlu2 %v695_v5 }
 0x2b5   :  { %v618_v7 = vpop.f32.mrf.mxu2 }
 0x2b6   :  { %v619_v8 = vadd.f32 %v618_v7, %v1259_v39 }
 0x2b8   :  { %v637_v9 = vmax.f32 %v619_v8, 0.0 }
 0x2ba   :  { %v654_v10 = vmul.f32 %v1261_v41, %v637_v9 }
 0x2bc   :  { %v698_v11 = vsel %vm549_vm4, %v654_v10, 0.0  ;;  %v815_v10 = vadd.s32 4294967240, %v1084_v27 }
 0x2bd   :  { %v620_v12 = vpop.f32.mrf.mxu2  ;;  %699 = vadd.xlane.f32.xlu0 %v698_v11  ;;  %v811_v11 = vadd.s32 4294967248, %v1084_v27 }
 0x2be   :  { %v621_v13 = vadd.f32 %v620_v12, %v1259_v39  ;;  %v711_v39 = vadd.f32 %v708_v20, %v661_v25 }
 0x2c0   :  { %v638_v15 = vmax.f32 %v621_v13, 0.0  ;;  %v819_v13 = vadd.s32 4294967232, %v1084_v27 }
 0x2c2   :  { %v655_v16 = vmul.f32 %v1261_v41, %v638_v15  ;;  %v715_v41 = vadd.f32 %v708_v20, %v673_v28 }
 0x2c4   :  { %v701_v17 = vsel %vm549_vm4, %v655_v16, 0.0 }
 0x2c5   :  { %702 = vadd.xlane.f32.xlu1 %v701_v17 }
 0x2cc   :  { %752 = vperm.xlu2 %968, %v713_v21   ;;  %v823_v21 = vadd.s32 4294967224, %v1084_v27 }
 0x2d1   :  { %743 = vperm.xlu0 %965, %v710_v22   ;;  %v831_v22 = vadd.s32 4294967208, %v1084_v27 }
 0x2d4   :  { %761 = vperm.xlu2 %968, %v716_v24  }
 0x2d9   :  { %749 = vperm.xlu0 %965, %v712_v26  }
 0x2de   :  { %746 = vperm.xlu1 %969, %v711_v39  }
 0x2e1   :  { %758 = vperm.xlu0 %965, %v715_v41  }
 0x2e6   :  { %755 = vperm.xlu1 %969, %v714_v30   ;;  %v839_v30 = vadd.s32 4294967192, %v1084_v27 }
 0x2ee   :  { %764 = vperm.xlu1 %969, %v717_v32  }
 0x2f0   :  { %v682_v2 = vpop.xlane.xlu0 %681 }
 0x2f1   :  { %v718_v3 = vadd.f32 %v708_v20, %v682_v2 }
 0x2f3   :  { %767 = vperm.xlu0 %965, %v718_v3  }
 0x2f8   :  { %v685_v34 = vpop.xlane.xlu1 %684 }
 0x2f9   :  { %v719_v35 = vadd.f32 %v708_v20, %v685_v34  ;;  %v843_v34 = vadd.s32 4294967184, %v1084_v27 }
 0x2fb   :  { %770 = vperm.xlu2 %968, %v719_v35  }
 0x300   :  { %v688_v36 = vpop.xlane.xlu2 %687 }
 0x301   :  { %v720_v37 = vadd.f32 %v708_v20, %v688_v36  ;;  %v847_v36 = vadd.s32 4294967176, %v1084_v27 }
 0x303   :  { %773 = vperm.xlu1 %969, %v720_v37  }
 0x308   :  { %v691_v38 = vpop.xlane.xlu0 %690 }
 0x309   :  { %v721_v40 = vadd.f32 %v708_v20, %v691_v38 }
 0x30b   :  { %776 = vperm.xlu0 %965, %v721_v40  }
 0x31f   :  { %v694_v33 = vpop.xlane.xlu1 %693 }
 0x320   :  { %v722_v42 = vadd.f32 %v708_v20, %v694_v33 }
 0x322   :  { %779 = vperm.xlu2 %968, %v722_v42  }
 0x327   :  { %v697_v43 = vpop.xlane.xlu2 %696 }
 0x328   :  { %v723_v44 = vadd.f32 %v708_v20, %v697_v43 }
 0x32a   :  { %782 = vperm.xlu1 %969, %v723_v44  }
 0x32f   :  { %v753_v51 = vpop.permute.xlu2 %752 }
 0x330   :  { %v700_v45 = vpop.xlane.xlu0 %699  ;;  %v800_v5 = vperm.slane %v753_v51, %v799_v61 }
 0x331   :  { %v724_v46 = vadd.f32 %v708_v20, %v700_v45 }
 0x333   :  { %785 = vperm.xlu0 %965, %v724_v46  }
 0x337   :  { %v762_v56 = vpop.permute.xlu2 %761 }
 0x338   :  { %v703_v47 = vpop.xlane.xlu1 %702  ;;  %v812_v18 = vperm.slane %v762_v56, %v811_v11 }
 0x339   :  { %v725_v48 = vadd.f32 %v708_v20, %v703_v47  ;;  %v827_v20 = vadd.s32 4294967216, %v1084_v27 }
 0x33b   :  { %788 = vperm.xlu2 %968, %v725_v48  }
 0x343   :  { %v744_v49 = vpop.permute.xlu0 %743 }
 0x344   :  { %v790_v59 = vperm.slane %v744_v49, %v1084_v27 }
 0x34b   :  { %v750_v52 = vpop.permute.xlu0 %749 }
 0x34c   :  { %v796_v63 = vperm.slane %v750_v52, %v795_v57 }
 0x350   :  { %v747_v50 = vpop.permute.xlu1 %746 }
 0x351   :  { %v792_v55 = vperm.slane %v747_v50, %v791_v54 }
 0x353   :  { %v759_v58 = vpop.permute.xlu0 %758  ;;  %v794_v62 = vsel %vm793_vm8, %v792_v55, %v790_v59 }
 0x354   :  { %v798_v1 = vsel %vm797_vm10, %v796_v63, %v794_v62  ;;  %v808_v14 = vperm.slane %v759_v58, %v807_v6 }
 0x355   :  { %v771_v7 = vpop.permute.xlu2 %770  ;;  %v802_v9 = vsel %vm801_vm5, %v800_v5, %v798_v1 }
 0x356   :  { %v824_v41 = vperm.slane %v771_v7, %v823_v21 }
 0x358   :  { %v756_v53 = vpop.permute.xlu1 %755 }
 0x359   :  { %v804_v4 = vperm.slane %v756_v53, %v803_v60 }
 0x35b   :  { %v806_v12 = vsel %vm805_vm6, %v804_v4, %v802_v9 }
 0x35c   :  { %v810_v16 = vsel %vm809_vm7, %v808_v14, %v806_v12 }
 0x35d   :  { %v814_v23 = vsel %vm813_vm9, %v812_v18, %v810_v16 }
 0x360   :  { %v765_v0 = vpop.permute.xlu1 %764 }
 0x361   :  { %v816_v17 = vperm.slane %v765_v0, %v815_v10 }
 0x363   :  { %v818_v26 = vsel %vm817_vm11, %v816_v17, %v814_v23 }
 0x365   :  { %v768_v8 = vpop.permute.xlu0 %767 }
 0x366   :  { %v820_v19 = vperm.slane %v768_v8, %v819_v13 }
 0x368   :  { %v822_v39 = vsel %vm821_vm12, %v820_v19, %v818_v26 }
 0x369   :  { %v826_v2 = vsel %vm825_vm13, %v824_v41, %v822_v39 }
 0x375   :  { %v774_v15 = vpop.permute.xlu1 %773 }
 0x376   :  { %v828_v28 = vperm.slane %v774_v15, %v827_v20 }
 0x378   :  { %v830_v3 = vsel %vm829_vm14, %v828_v28, %v826_v2 }
 0x37c   :  { %v780_v24 = vpop.permute.xlu2 %779 }
 0x37d   :  { %v777_v25 = vpop.permute.xlu0 %776  ;;  %v836_v38 = vperm.slane %v780_v24, %v835_v31 }
 0x37e   :  { %v832_v29 = vperm.slane %v777_v25, %v831_v22 }
 0x380   :  { %v834_v35 = vsel %vm833_vm15, %v832_v29, %v830_v3 }
 0x381   :  { %v838_v42 = vsel %vm837_vm0, %v836_v38, %v834_v35 }
 0x395   :  { %v789_v40 = vpop.permute.xlu2 %788 }
 0x396   :  { %v848_v44 = vperm.slane %v789_v40, %v847_v36 }
 0x39c   :  { %v783_v32 = vpop.permute.xlu1 %782 }
 0x39d   :  { %v840_v37 = vperm.slane %v783_v32, %v839_v30 }
 0x39f   :  { %v842_v45 = vsel %vm841_vm1, %v840_v37, %v838_v42 }
 0x3a5   :  { %v786_v33 = vpop.permute.xlu0 %785 }
 0x3a6   :  { %v844_v43 = vperm.slane %v786_v33, %v843_v34 }
 0x3a8   :  { %v846_v46 = vsel %vm845_vm2, %v844_v43, %v842_v45 }
 0x3a9   :  { %v850_v27 = vsel %vm849_vm3, %v848_v44, %v846_v46 }
 0x3aa   :  { %852 = vst [vmem:[#allocation2] sm:$0x1] %v850_v27 }
 0x3ab   :  { %863 = dma.vmem_to_hbm [thread:$0]  %s859_s4, 16, %s861_s22, [#allocation3]  }
 0x3ac   :  { %994 = dma.done.wait [#allocation3], 16  }
 0x3ad   :  { %995 = vsyncadd [#allocation3], 4294967280 }
 0x3ae   :  { %868 = vsyncpa [#allocation3], 1 }

</bundles_post_ra>
